<compile_context>
chip_gen: v5e
topology: v5e:2x2
jax: 0.10.0
libtpu: 0.0.40
codegen_flags: <defaults>
</compile_context>

<pallas_src>
import jax
import jax.numpy as jnp
from jax.experimental import pallas as pl
from jax.experimental.pallas import tpu as pltpu


def _copy2d_kernel(x_ref, o_ref):
    # x_ref, o_ref: (tb, D) VMEM tiles.  The set-dim select already happened
    # in the BlockSpec, so the body is a straight copy (pure DMA roofline).
    o_ref[...] = x_ref[...]


def _slice3d_kernel(x_ref, o_ref):
    # x_ref: (tb, S, D), o_ref: (tb, D).  Static index on the set axis; this
    # is a contiguous sub-tile read, not a gather.
    o_ref[...] = x_ref[:, 0, :]


def _tile_rows(batch: int, want: int, itemsize: int) -> int:
    """Pick a batch tile: full B if small, else a sublane-aligned tile."""
    if want >= batch:
        return batch
    sub = max(8, 32 // max(itemsize, 1))  # 8 rows f32 / 16 bf16 / 32 int8
    tb = max(sub, (want // sub) * sub)
    return min(tb, batch)


def first_pool(x: jax.Array, *, block_rows: int = 512) -> jax.Array:
    """Pallas implementation of FirstPoolModule.forward: x[:, 0].

    x: (B, S, D) -> (B, D)
    """
    B, S, D = x.shape
    itemsize = jnp.dtype(x.dtype).itemsize
    params = pltpu.CompilerParams(dimension_semantics=("parallel",))
    out_shape = jax.ShapeDtypeStruct((B, D), x.dtype)

    if D % 128 == 0 or S == 1:
        # Lane-dense fast path: only B*D elements are ever DMA'd.
        tb = _tile_rows(B, block_rows, itemsize)
        grid = (pl.cdiv(B, tb),)
        x2 = x.reshape(B, S * D)  # free, row-major metadata reshape
        return pl.pallas_call(
            _copy2d_kernel,
            out_shape=out_shape,
            grid=grid,
            in_specs=[pl.BlockSpec((tb, D), lambda i: (i, 0))],
            out_specs=pl.BlockSpec((tb, D), lambda i: (i, 0)),
            compiler_params=params,
        )(x2)

    # Fallback (D not lane-aligned, S > 1): full (S, D) trailing block keeps
    # the BlockSpec legal on all chips; slice the set axis in-kernel.  Cap the
    # batch tile so 2x double-buffered input blocks stay under ~8 MiB.
    budget_rows = max(1, (4 << 20) // max(1, S * D * itemsize))
    tb = _tile_rows(B, min(block_rows, budget_rows), itemsize)
    grid = (pl.cdiv(B, tb),)
    return pl.pallas_call(
        _slice3d_kernel,
        out_shape=out_shape,
        grid=grid,
        in_specs=[pl.BlockSpec((tb, S, D), lambda i: (i, 0, 0))],
        out_specs=pl.BlockSpec((tb, D), lambda i: (i, 0)),
        compiler_params=params,
    )(x)


if __name__ == "__main__":
    key = jax.random.PRNGKey(0)

    # (shape, dtype, block_rows) -- small set-model shapes covering all paths.
    checks = [
        ((2, 8, 128), jnp.float32, 512),    # fast path, tiny batch (grid of 1)
        ((24, 8, 128), jnp.float32, 8),     # fast path, tiled batch (grid of 3)
        ((20, 8, 128), jnp.float32, 8),     # fast path, ragged last block
        ((10, 4, 256), jnp.bfloat16, 512),  # fast path, bf16
        ((4, 1, 96), jnp.float32, 512),     # fast path via S == 1
        ((16, 5, 96), jnp.float32, 512),    # fallback path (D not lane-aligned)
    ]
    for idx, (shape, dtype, block_rows) in enumerate(checks):
        key, sub = jax.random.split(key)
        x = jax.random.normal(sub, shape, dtype=jnp.float32).astype(dtype)
        out = jax.block_until_ready(first_pool(x, block_rows=block_rows))
        ref = x[:, 0]
        assert out.shape == ref.shape, (idx, out.shape, ref.shape)
        assert out.dtype == ref.dtype, (idx, out.dtype, ref.dtype)
        assert jnp.array_equal(out, ref), f"mismatch vs reference slice (case {idx})"

    print("KERNEL_OK")
</pallas_src>

<mosaic_0001>
module attributes {stable_mosaic.version = 11 : i64} {
  func.func @_copy2d_kernel(%arg0: i32, %arg1: memref<2x128xf32, #tpu.memory_space<vmem>>, %arg2: memref<2x128xf32, #tpu.memory_space<vmem>>) attributes {dimension_semantics = [#tpu.dimension_semantics<parallel>], iteration_bounds = array<i64: 1>, scalar_prefetch = 0 : i64, scratch_operands = 0 : i64, tpu.core_type = #tpu.core_type<tc>, window_params = [{transform_indices = @transform_0, window_bounds = array<i64: 2, 128>}, {transform_indices = @transform_1, window_bounds = array<i64: 2, 128>}]} {
    %c0 = arith.constant 0 : index
    %c0_0 = arith.constant 0 : index
    %0 = vector.load %arg1[%c0, %c0_0] : memref<2x128xf32, #tpu.memory_space<vmem>>, vector<2x128xf32>
    %c0_1 = arith.constant 0 : index
    %c0_2 = arith.constant 0 : index
    %1 = vector.load %arg2[%c0_1, %c0_2] : memref<2x128xf32, #tpu.memory_space<vmem>>, vector<2x128xf32>
    tpu.vector_store %arg2[%c0_1, %c0_2], %0 {strides = array<i32>} : memref<2x128xf32, #tpu.memory_space<vmem>>, vector<2x128xf32>,
    return
  }
  func.func @transform_0(%arg0: i32) -> (i32, i32) {
    %c0_i32 = arith.constant 0 : i32
    %c0_i32_0 = arith.constant 0 : i32
    return %arg0, %c0_i32 : i32, i32
  }
  func.func @transform_1(%arg0: i32) -> (i32, i32) {
    %c0_i32 = arith.constant 0 : i32
    %c0_i32_0 = arith.constant 0 : i32
    return %arg0, %c0_i32 : i32, i32
  }
}

</mosaic_0001>

<bundles_post_ra>
// kernel: tpu_custom_call.1
= control target key start
LH: loop header
LB: loop body
LE: loop exit
PB: predicated region body
PF: predicated region fallthrough
CT: control target
= control target key end

     0   :  { %6 = vsyncpa [#allocation3], 0  ;;  %s114_s0 = inlined_call_operand.hbm [shape: f32[2,1024], index: 0, kind: input, shape index: {}]   ;;  %s115_s1 = inlined_call_operand.hbm [shape: f32[2,128], index: 1, kind: output, shape index: {}]  }
   0x1   :  { %7 = vsyncpa [#allocation4], 0  ;;  %s13_s8 = sshll.u32 %s114_s0, 4  ;;  %s96_s9 = smov [#allocation2]   ;;  %s14_s8 = int_to_ptr.hbm [resolvable:$true] %s13_s8 }
   0x2   :  { %s15_s10 = sshll.u32 %s96_s9, 4  ;;  %s16_s10 = int_to_ptr.vmem [resolvable:$true] %s15_s10 }
   0x3   :  { %18 = dma.hbm_to_vmem [thread:$0]  %s14_s8, 32, %s16_s10, [#allocation3]  }
   0x4   :  { %92 = dma.done.wait [#allocation3], 32  }
   0x5   :  { %93 = vsyncadd [#allocation3], 4294967264  ;;  %s97_s11 = smov [#allocation5]   ;;  %s32_s15 = sshll.u32 %s115_s1, 4  ;;  %v23_v0 = vld [vmem:[#allocation2] sm:$0x3]  ;;  %s33_s15 = int_to_ptr.hbm [resolvable:$true] %s32_s15 }
   0x6   :  { %s30_s12 = sshll.u32 %s97_s11, 4  ;;  %24 = vst [vmem:[#allocation5] sm:$0x3] %v23_v0  ;;  %s31_s12 = int_to_ptr.vmem [resolvable:$true] %s30_s12 }
   0x7   :  { %35 = dma.vmem_to_hbm [thread:$0]  %s31_s12, 32, %s33_s15, [#allocation4]  }
   0x8   :  { %94 = dma.done.wait [#allocation4], 32  }
   0x9   :  { %95 = vsyncadd [#allocation4], 4294967264 }
   0xa   :  { %40 = vsyncpa [#allocation3], 1 }
   0xb   :  { %41 = vsyncpa [#allocation4], 1 }

</bundles_post_ra>
